<compile_context>
chip_gen: v6e
topology: v6e:2x2x1
jax: 0.10.0
libtpu: 0.0.40
codegen_flags: <defaults>
</compile_context>

<pallas_src>
import functools

import jax
import jax.numpy as jnp
from jax import lax
from jax.experimental import pallas as pl
from jax.experimental.pallas import tpu as pltpu


# ------------------------------ helpers ------------------------------------ #

def _sublane_align(dtype):
    itemsize = jnp.dtype(dtype).itemsize
    return {4: 8, 2: 16, 1: 32}.get(itemsize, 8)


def _pick_tile(n, target, align):
    """Tile for an axis of extent n: largest aligned divisor <= target, else the
    smallest aligned divisor > target, else the full extent (full-extent blocks
    are always legal).  Never pads, so no extra HBM copies."""
    if n <= target:
        return n
    for t in range(target, align - 1, -1):
        if n % t == 0 and t % align == 0:
            return t
    for t in range(target + 1, n):
        if n % t == 0 and t % align == 0:
            return t
    return n  # TODO(synk): ragged (e.g. prime) extents fall back to a full block.


def _mxu_precision(dtype):
    # Exact f32 matmuls for f32 activations; native bf16 operands otherwise.
    return (lax.Precision.HIGHEST if jnp.dtype(dtype) == jnp.float32
            else lax.Precision.DEFAULT)


# --------------- projection kernel with fused head split -------------------- #
# y = x @ W  (no bias), written directly in (B, NH, N, D) head-split layout so
# the 'b n (h d) -> b h n d' rearrange never touches HBM.

def _proj_heads_kernel(x_ref, w_ref, o_ref, acc_ref, *, nh, d, precision):
    k = pl.program_id(2)

    @pl.when(k == 0)
    def _init():
        acc_ref[...] = jnp.zeros(acc_ref.shape, acc_ref.dtype)

    # full-width matmul (n = NH*D) -> full MXU output columns
    acc_ref[...] += jnp.dot(x_ref[0], w_ref[...],
                            preferred_element_type=jnp.float32,
                            precision=precision)

    @pl.when(k == pl.num_programs(2) - 1)
    def _finalize():
        # scatter (tm, NH*D) accumulator into the head-split output block
        # (NH, tm, D); in-VMEM copies, once per output tile (amortized over K).
        for h in range(nh):
            o_ref[0, h] = acc_ref[:, h * d:(h + 1) * d].astype(o_ref.dtype)


def project_heads(x, w, dim_head, *, tm_target=256, tk_target=512):
    """x: (B, N, C), w: (C, NH*dim_head) -> (B, NH, N, dim_head)."""
    B, N, C = x.shape
    Cw, F = w.shape
    assert C == Cw and F % dim_head == 0
    nh = F // dim_head
    dtype = x.dtype
    w = w.astype(dtype)

    tm = _pick_tile(N, tm_target, _sublane_align(dtype))
    tk = _pick_tile(C, tk_target, 128)
    grid = (B, N // tm, C // tk)
    precision = _mxu_precision(dtype)
    itemsize = jnp.dtype(dtype).itemsize

    cost = pl.CostEstimate(
        flops=2 * B * N * C * F,
        transcendentals=0,
        bytes_accessed=(B * N * C + B * (N // tm) * C * F + B * N * F) * itemsize,
    )

    return pl.pallas_call(
        functools.partial(_proj_heads_kernel, nh=nh, d=dim_head,
                          precision=precision),
        out_shape=jax.ShapeDtypeStruct((B, nh, N, dim_head), dtype),
        grid_spec=pltpu.PrefetchScalarGridSpec(
            num_scalar_prefetch=0,
            grid=grid,
            in_specs=[
                pl.BlockSpec((1, tm, tk), lambda b, i, k: (b, i, k)),
                pl.BlockSpec((tk, F), lambda b, i, k: (k, 0)),
            ],
            out_specs=pl.BlockSpec((1, nh, tm, dim_head),
                                   lambda b, i, k: (b, 0, i, 0)),
            scratch_shapes=[pltpu.VMEM((tm, F), jnp.float32)],
        ),
        compiler_params=pltpu.CompilerParams(
            dimension_semantics=("parallel", "parallel", "arbitrary"),
            vmem_limit_bytes=64 * 1024 * 1024,
        ),
        cost_estimate=cost,
    )(x, w)


# ------------------------ flash attention kernel ---------------------------- #
# q/k/v are read directly out of the head-split projection outputs via
# head-offset index maps (no HBM slicing, no transposes).  Softmax scale is
# already folded into W_q.

def _flash_kernel(q_ref, k_ref, v_ref, o_ref, m_ref, l_ref, acc_ref, *,
                  precision):
    kv = pl.program_id(3)

    @pl.when(kv == 0)
    def _init():
        m_ref[...] = jnp.full(m_ref.shape, -jnp.inf, m_ref.dtype)
        l_ref[...] = jnp.zeros(l_ref.shape, l_ref.dtype)
        acc_ref[...] = jnp.zeros(acc_ref.shape, acc_ref.dtype)

    q = q_ref[0]                      # (G, tq, D)   scale folded into W_q
    k = k_ref[0]                      # (G, tk, D)
    v = v_ref[0]                      # (G, tk, D)

    # s[g, i, j] = sum_d q[g, i, d] * k[g, j, d]
    s = lax.dot_general(q, k, (((2,), (2,)), ((0,), (0,))),
                        preferred_element_type=jnp.float32,
                        precision=precision)          # (G, tq, tk)

    m_prev = m_ref[...]
    m_new = jnp.maximum(m_prev, jnp.max(s, axis=-1, keepdims=True))
    alpha = jnp.exp(m_prev - m_new)
    p = jnp.exp(s - m_new)

    l_ref[...] = alpha * l_ref[...] + jnp.sum(p, axis=-1, keepdims=True)
    # bf16 inputs -> bf16 P on the MXU; f32 inputs stay exact f32.
    acc_ref[...] = alpha * acc_ref[...] + lax.dot_general(
        p.astype(v.dtype), v, (((2,), (1,)), ((0,), (0,))),
        preferred_element_type=jnp.float32, precision=precision)
    m_ref[...] = m_new

    @pl.when(kv == pl.num_programs(3) - 1)
    def _finalize():
        # exact normalization (approx reciprocal only worth it for bf16 output)
        o_ref[0] = (acc_ref[...] / l_ref[...]).astype(o_ref.dtype)


def flash_attention(q_src, k_src, v_src, *, heads, q_head0, k_head0, v_head0,
                    tq_target=256, tk_target=512, group_target=4):
    """q_src/k_src/v_src: (B, NH_src, N, D) head-split buffers (may be the same
    array); heads of q/k/v start at head index {q,k,v}_head0.  Returns
    (B, heads, Nq, D)."""
    B, _, Nq, D = q_src.shape
    Bk, _, Nk, Dk = k_src.shape
    assert B == Bk and D == Dk
    dtype = q_src.dtype
    sub = _sublane_align(dtype)

    tq = _pick_tile(Nq, tq_target, sub)
    tk = _pick_tile(Nk, tk_target, sub)

    g = min(heads, group_target)
    while heads % g:
        g -= 1
    # v7x megacore: keep at least 2 parallel units of work across (B, H/G, Nq/tq).
    while g > 1 and B * (heads // g) * (Nq // tq) < 2:
        g -= 1
        while heads % g:
            g -= 1
    assert q_head0 % g == 0 and k_head0 % g == 0 and v_head0 % g == 0
    qh0, kh0, vh0 = q_head0 // g, k_head0 // g, v_head0 // g

    grid = (B, heads // g, Nq // tq, Nk // tk)
    precision = _mxu_precision(dtype)
    itemsize = jnp.dtype(dtype).itemsize

    cost = pl.CostEstimate(
        flops=4 * B * heads * Nq * Nk * D,
        transcendentals=B * heads * Nq * Nk,
        # q + out once, k/v re-fetched once per q tile
        bytes_accessed=B * heads * (2 * Nq * D
                                    + 2 * (Nq // tq) * Nk * D) * itemsize,
    )

    return pl.pallas_call(
        functools.partial(_flash_kernel, precision=precision),
        out_shape=jax.ShapeDtypeStruct((B, heads, Nq, D), dtype),
        grid_spec=pltpu.PrefetchScalarGridSpec(
            num_scalar_prefetch=0,
            grid=grid,
            in_specs=[
                pl.BlockSpec((1, g, tq, D),
                             lambda b, hg, qi, ki: (b, qh0 + hg, qi, 0)),
                pl.BlockSpec((1, g, tk, D),
                             lambda b, hg, qi, ki: (b, kh0 + hg, ki, 0)),
                pl.BlockSpec((1, g, tk, D),
                             lambda b, hg, qi, ki: (b, vh0 + hg, ki, 0)),
            ],
            out_specs=pl.BlockSpec((1, g, tq, D),
                                   lambda b, hg, qi, ki: (b, hg, qi, 0)),
            scratch_shapes=[
                pltpu.VMEM((g, tq, 1), jnp.float32),   # running max
                pltpu.VMEM((g, tq, 1), jnp.float32),   # running denom
                pltpu.VMEM((g, tq, D), jnp.float32),   # output accumulator
            ],
        ),
        compiler_params=pltpu.CompilerParams(
            dimension_semantics=("parallel", "parallel", "parallel", "arbitrary"),
            vmem_limit_bytes=64 * 1024 * 1024,
        ),
        cost_estimate=cost,
    )(q_src, k_src, v_src)


# --------------- output projection with fused head merge -------------------- #
# y = concat_heads(attn) @ W_out + b, with the '(b h) n d -> (b n) (h d)' merge
# fused into the in_specs (reduction over heads; each K step contracts D).

def _out_proj_kernel(a_ref, w_ref, b_ref, o_ref, acc_ref, *, precision):
    h = pl.program_id(3)

    @pl.when(h == 0)
    def _init():
        acc_ref[...] = jnp.zeros(acc_ref.shape, acc_ref.dtype)

    acc_ref[...] += jnp.dot(a_ref[0, 0], w_ref[0],
                            preferred_element_type=jnp.float32,
                            precision=precision)

    @pl.when(h == pl.num_programs(3) - 1)
    def _finalize():
        o_ref[0] = (acc_ref[...] + b_ref[...]).astype(o_ref.dtype)


def out_project(attn, w_r, bias, *, tm_target=256, tn_target=512):
    """attn: (B, H, N, D), w_r: (H, D, C), bias: (C,) -> (B, N, C)."""
    B, H, N, D = attn.shape
    Hw, Dw, C = w_r.shape
    assert (H, D) == (Hw, Dw)
    dtype = attn.dtype
    w_r = w_r.astype(dtype)
    b2 = bias.astype(jnp.float32).reshape(1, C)

    tm = _pick_tile(N, tm_target, _sublane_align(dtype))
    tn = _pick_tile(C, tn_target, 128)
    grid = (B, N // tm, C // tn, H)
    precision = _mxu_precision(dtype)
    itemsize = jnp.dtype(dtype).itemsize

    cost = pl.CostEstimate(
        flops=2 * B * N * H * D * C,
        transcendentals=0,
        bytes_accessed=(B * N * H * D * (C // tn)
                        + B * (N // tm) * H * D * C
                        + B * N * C) * itemsize,
    )

    return pl.pallas_call(
        functools.partial(_out_proj_kernel, precision=precision),
        out_shape=jax.ShapeDtypeStruct((B, N, C), dtype),
        grid_spec=pltpu.PrefetchScalarGridSpec(
            num_scalar_prefetch=0,
            grid=grid,
            in_specs=[
                pl.BlockSpec((1, 1, tm, D), lambda b, i, j, h: (b, h, i, 0)),
                pl.BlockSpec((1, D, tn), lambda b, i, j, h: (h, 0, j)),
                pl.BlockSpec((1, tn), lambda b, i, j, h: (0, j)),
            ],
            out_specs=pl.BlockSpec((1, tm, tn), lambda b, i, j, h: (b, i, j)),
            scratch_shapes=[pltpu.VMEM((tm, tn), jnp.float32)],
        ),
        compiler_params=pltpu.CompilerParams(
            dimension_semantics=("parallel", "parallel", "parallel", "arbitrary"),
            vmem_limit_bytes=64 * 1024 * 1024,
        ),
        cost_estimate=cost,
    )(attn, w_r, b2)


# ----------------------------- module wrapper ------------------------------- #

class CrossAttentionPallas:
    """JAX/Pallas port of CrossAttention.

    Forward paths matching the PyTorch forward with relative_position=False,
    image_cross_attention=False, mask=None:
      * self-attention (context=None)      -> one fused q|k|v projection
      * text cross-attention (truncated to text_context_len)
                                           -> q projection + fused k|v projection
    """

    def __init__(self, query_dim, context_dim=None, heads=8, dim_head=64,
                 dropout=0.0, text_context_len=77, key=None):
        if key is None:
            key = jax.random.PRNGKey(0)
        context_dim = query_dim if context_dim is None else context_dim
        inner_dim = heads * dim_head
        self.heads = heads
        self.dim_head = dim_head
        self.inner_dim = inner_dim
        self.scale = dim_head ** (-0.5)
        self.text_context_len = text_context_len

        kq, kk, kv, ko, kb = jax.random.split(key, 5)

        def xavier(k_, fan_in, fan_out):
            limit = (6.0 / (fan_in + fan_out)) ** 0.5
            # stored as (in, out) so forward is x @ W  (== PyTorch x @ W_pt.T)
            return jax.random.uniform(k_, (fan_in, fan_out), jnp.float32,
                                      -limit, limit)

        self.w_q = xavier(kq, query_dim, inner_dim)
        self.w_k = xavier(kk, context_dim, inner_dim)
        self.w_v = xavier(kv, context_dim, inner_dim)
        self.w_out = xavier(ko, inner_dim, query_dim)
        bound = 1.0 / (inner_dim ** 0.5)
        self.b_out = jax.random.uniform(kb, (query_dim,), jnp.float32,
                                        -bound, bound)

        # Kernel-side fused / reshaped weights (built once at init):
        #   * softmax scale folded into W_q,
        #   * fused q|k|v (self-attn) and k|v (cross-attn) so activations are
        #     read from HBM once per projection,
        #   * W_out reshaped (H, D, C) for the head-merge-fused out projection.
        self.w_q_f = self.w_q * self.scale
        self.w_qkv_f = (jnp.concatenate([self.w_q_f, self.w_k, self.w_v], axis=1)
                        if context_dim == query_dim else None)
        self.w_kv_f = jnp.concatenate([self.w_k, self.w_v], axis=1)
        self.w_out_r = self.w_out.reshape(heads, dim_head, query_dim)

        # TODO(synk): dropout in to_out is an inference no-op; not implemented.
        # TODO(synk): relative_position / image_cross_attention branches and the
        #             mask path are not implemented (not exercised here).

    def __call__(self, x, context=None, mask=None):
        assert mask is None, "mask path not implemented"
        B, Nq, C = x.shape
        H, D = self.heads, self.dim_head

        if context is None:
            assert self.w_qkv_f is not None
            # fused q|k|v projection, head-split output (B, 3H, Nq, D)
            qkv = project_heads(x, self.w_qkv_f, D)
            attn = flash_attention(qkv, qkv, qkv, heads=H,
                                   q_head0=0, k_head0=H, v_head0=2 * H)
        else:
            ctx = context[:, :self.text_context_len, :]
            Bc = ctx.shape[0]
            assert Bc == B, "context batch must match x batch"
            qh = project_heads(x, self.w_q_f, D)          # (B, H, Nq, D)
            kvh = project_heads(ctx, self.w_kv_f, D)      # (B, 2H, Nk, D)
            attn = flash_attention(qh, kvh, kvh, heads=H,
                                   q_head0=0, k_head0=0, v_head0=H)

        # head merge is fused into out_project's in_specs
        return out_project(attn, self.w_out_r, self.b_out)   # (B, Nq, C)


# ---------------------------------- main ------------------------------------ #

if __name__ == "__main__":
    key = jax.random.PRNGKey(0)
    k_x, k_c, k_w = jax.random.split(key, 3)

    # Small shapes: batch=2, seq=16, query_dim=32, heads=4, dim_head=8
    B, N, C = 2, 16, 32
    heads, dim_head = 4, 8
    x = jax.random.normal(k_x, (B, N, C), jnp.float32)

    attn = CrossAttentionPallas(query_dim=C, heads=heads, dim_head=dim_head,
                                key=k_w)

    # Pure-JAX reference at exact matmul precision.
    HI = lax.Precision.HIGHEST

    def ref_attention(xq, xc):
        b, nq = xq.shape[0], xq.shape[1]
        nk = xc.shape[1]
        q = jnp.einsum('bnc,ce->bne', xq, attn.w_q, precision=HI)
        k = jnp.einsum('bnc,ce->bne', xc, attn.w_k, precision=HI)
        v = jnp.einsum('bnc,ce->bne', xc, attn.w_v, precision=HI)
        q = q.reshape(b, nq, heads, dim_head)
        k = k.reshape(b, nk, heads, dim_head)
        v = v.reshape(b, nk, heads, dim_head)
        sim = jnp.einsum('bihd,bjhd->bhij', q, k, precision=HI) * attn.scale
        p = jax.nn.softmax(sim, axis=-1)
        o = jnp.einsum('bhij,bjhd->bihd', p, v, precision=HI)
        o = o.reshape(b, nq, heads * dim_head)
        return jnp.einsum('bne,ec->bnc', o, attn.w_out, precision=HI) + attn.b_out

    # self-attention path
    y = jax.block_until_ready(attn(x))
    ref = ref_attention(x, x)
    assert y.shape == (B, N, C)
    assert jnp.allclose(y, ref, atol=2e-3, rtol=2e-3), "self-attn mismatch"

    # cross-attention path (text context, shorter than text_context_len)
    Nc = 8
    ctx = jax.random.normal(k_c, (B, Nc, C), jnp.float32)
    y2 = jax.block_until_ready(attn(x, context=ctx))
    ref2 = ref_attention(x, ctx)
    assert y2.shape == (B, N, C)
    assert jnp.allclose(y2, ref2, atol=2e-3, rtol=2e-3), "cross-attn mismatch"

    print("KERNEL_OK")
</pallas_src>

<mosaic_0001>
module attributes {stable_mosaic.version = 11 : i64} {
  func.func @_proj_heads_kernel(%arg0: i32, %arg1: i32, %arg2: i32, %arg3: memref<1x16x32xf32, #tpu.memory_space<vmem>>, %arg4: memref<32x96xf32, #tpu.memory_space<vmem>>, %arg5: memref<1x12x16x8xf32, #tpu.memory_space<vmem>>, %arg6: memref<16x96xf32, #tpu.memory_space<vmem>>) attributes {dimension_semantics = [#tpu.dimension_semantics<parallel>, #tpu.dimension_semantics<parallel>, #tpu.dimension_semantics<arbitrary>], iteration_bounds = array<i64: 2, 1, 1>, scalar_prefetch = 0 : i64, scratch_operands = 1 : i64, tpu.core_type = #tpu.core_type<tc>, window_params = [{transform_indices = @transform_0, window_bounds = array<i64: 1, 16, 32>}, {transform_indices = @transform_1, window_bounds = array<i64: 32, 96>}, {transform_indices = @transform_2, window_bounds = array<i64: 1, 12, 16, 8>}]} {
    %c0_i32 = arith.constant 0 : i32
    %0 = arith.cmpi eq, %arg2, %c0_i32 : i32
    %1 = arith.extui %0 : i1 to i32
    %c0_i32_0 = arith.constant 0 : i32
    %2 = arith.cmpi ne, %1, %c0_i32_0 : i32
    scf.if %2 {
      %cst_11 = arith.constant 0.000000e+00 : f32
      %13 = vector.broadcast %cst_11 : f32 to vector<16x96xf32>
      %c0_12 = arith.constant 0 : index
      %c0_13 = arith.constant 0 : index
      %14 = vector.load %arg6[%c0_12, %c0_13] : memref<16x96xf32, #tpu.memory_space<vmem>>, vector<16x96xf32>
      tpu.vector_store %arg6[%c0_12, %c0_13], %13 {strides = array<i32>} : memref<16x96xf32, #tpu.memory_space<vmem>>, vector<16x96xf32>,
    } else {
    }
    %c0 = arith.constant 0 : index
    %c0_1 = arith.constant 0 : index
    %3 = vector.load %arg6[%c0, %c0_1] : memref<16x96xf32, #tpu.memory_space<vmem>>, vector<16x96xf32>
    %c0_2 = arith.constant 0 : index
    %c0_3 = arith.constant 0 : index
    %c0_4 = arith.constant 0 : index
    %4 = vector.load %arg3[%c0_2, %c0_3, %c0_4] : memref<1x16x32xf32, #tpu.memory_space<vmem>>, vector<1x16x32xf32>
    %5 = vector.shape_cast %4 : vector<1x16x32xf32> to vector<16x32xf32>
    %c0_5 = arith.constant 0 : index
    %c0_6 = arith.constant 0 : index
    %6 = vector.load %arg4[%c0_5, %c0_6] : memref<32x96xf32, #tpu.memory_space<vmem>>, vector<32x96xf32>
    %cst = arith.constant dense<0.000000e+00> : vector<16x96xf32>
    %7 = tpu.matmul %5, %6, %cst {dimension_numbers = #tpu.dot_dimension_numbers<[1], [0], [0], [1], [0, 0, 1, 1], [], []>, precision = #tpu.contract_precision<fp32>} : vector<16x32xf32>, vector<32x96xf32>, vector<16x96xf32> -> vector<16x96xf32>
    %8 = arith.addf %3, %7 : vector<16x96xf32>
    %c0_7 = arith.constant 0 : index
    %c0_8 = arith.constant 0 : index
    %9 = vector.load %arg6[%c0_7, %c0_8] : memref<16x96xf32, #tpu.memory_space<vmem>>, vector<16x96xf32>
    tpu.vector_store %arg6[%c0_7, %c0_8], %8 {strides = array<i32>} : memref<16x96xf32, #tpu.memory_space<vmem>>, vector<16x96xf32>,
    %c0_i32_9 = arith.constant 0 : i32
    %10 = arith.cmpi eq, %arg2, %c0_i32_9 : i32
    %11 = arith.extui %10 : i1 to i32
    %c0_i32_10 = arith.constant 0 : i32
    %12 = arith.cmpi ne, %11, %c0_i32_10 : i32
    scf.if %12 {
      %c0_11 = arith.constant 0 : index
      %c0_12 = arith.constant 0 : index
      %13 = vector.load %arg6[%c0_11, %c0_12] : memref<16x96xf32, #tpu.memory_space<vmem>>, vector<16x8xf32>
      %c0_13 = arith.constant 0 : index
      %c0_14 = arith.constant 0 : index
      %c0_15 = arith.constant 0 : index
      %c0_16 = arith.constant 0 : index
      %14 = vector.load %arg5[%c0_13, %c0_14, %c0_15, %c0_16] : memref<1x12x16x8xf32, #tpu.memory_space<vmem>>, vector<1x1x16x8xf32>
      %15 = vector.shape_cast %14 : vector<1x1x16x8xf32> to vector<16x8xf32>
      %16 = vector.shape_cast %13 : vector<16x8xf32> to vector<1x1x16x8xf32>
      tpu.vector_store %arg5[%c0_13, %c0_14, %c0_15, %c0_16], %16 {strides = array<i32>} : memref<1x12x16x8xf32, #tpu.memory_space<vmem>>, vector<1x1x16x8xf32>,
      %c0_17 = arith.constant 0 : index
      %c8 = arith.constant 8 : index
      %17 = vector.load %arg6[%c0_17, %c8] : memref<16x96xf32, #tpu.memory_space<vmem>>, vector<16x8xf32>
      %c0_18 = arith.constant 0 : index
      %c1 = arith.constant 1 : index
      %c0_19 = arith.constant 0 : index
      %c0_20 = arith.constant 0 : index
      %18 = vector.load %arg5[%c0_18, %c1, %c0_19, %c0_20] : memref<1x12x16x8xf32, #tpu.memory_space<vmem>>, vector<1x1x16x8xf32>
      %19 = vector.shape_cast %18 : vector<1x1x16x8xf32> to vector<16x8xf32>
      %20 = vector.shape_cast %17 : vector<16x8xf32> to vector<1x1x16x8xf32>
      tpu.vector_store %arg5[%c0_18, %c1, %c0_19, %c0_20], %20 {strides = array<i32>} : memref<1x12x16x8xf32, #tpu.memory_space<vmem>>, vector<1x1x16x8xf32>,
      %c0_21 = arith.constant 0 : index
      %c16 = arith.constant 16 : index
      %21 = vector.load %arg6[%c0_21, %c16] : memref<16x96xf32, #tpu.memory_space<vmem>>, vector<16x8xf32>
      %c0_22 = arith.constant 0 : index
      %c2 = arith.constant 2 : index
      %c0_23 = arith.constant 0 : index
      %c0_24 = arith.constant 0 : index
      %22 = vector.load %arg5[%c0_22, %c2, %c0_23, %c0_24] : memref<1x12x16x8xf32, #tpu.memory_space<vmem>>, vector<1x1x16x8xf32>
      %23 = vector.shape_cast %22 : vector<1x1x16x8xf32> to vector<16x8xf32>
      %24 = vector.shape_cast %21 : vector<16x8xf32> to vector<1x1x16x8xf32>
      tpu.vector_store %arg5[%c0_22, %c2, %c0_23, %c0_24], %24 {strides = array<i32>} : memref<1x12x16x8xf32, #tpu.memory_space<vmem>>, vector<1x1x16x8xf32>,
      %c0_25 = arith.constant 0 : index
      %c24 = arith.constant 24 : index
      %25 = vector.load %arg6[%c0_25, %c24] : memref<16x96xf32, #tpu.memory_space<vmem>>, vector<16x8xf32>
      %c0_26 = arith.constant 0 : index
      %c3 = arith.constant 3 : index
      %c0_27 = arith.constant 0 : index
      %c0_28 = arith.constant 0 : index
      %26 = vector.load %arg5[%c0_26, %c3, %c0_27, %c0_28] : memref<1x12x16x8xf32, #tpu.memory_space<vmem>>, vector<1x1x16x8xf32>
      %27 = vector.shape_cast %26 : vector<1x1x16x8xf32> to vector<16x8xf32>
      %28 = vector.shape_cast %25 : vector<16x8xf32> to vector<1x1x16x8xf32>
      tpu.vector_store %arg5[%c0_26, %c3, %c0_27, %c0_28], %28 {strides = array<i32>} : memref<1x12x16x8xf32, #tpu.memory_space<vmem>>, vector<1x1x16x8xf32>,
      %c0_29 = arith.constant 0 : index
      %c32 = arith.constant 32 : index
      %29 = vector.load %arg6[%c0_29, %c32] : memref<16x96xf32, #tpu.memory_space<vmem>>, vector<16x8xf32>
      %c0_30 = arith.constant 0 : index
      %c4 = arith.constant 4 : index
      %c0_31 = arith.constant 0 : index
      %c0_32 = arith.constant 0 : index
      %30 = vector.load %arg5[%c0_30, %c4, %c0_31, %c0_32] : memref<1x12x16x8xf32, #tpu.memory_space<vmem>>, vector<1x1x16x8xf32>
      %31 = vector.shape_cast %30 : vector<1x1x16x8xf32> to vector<16x8xf32>
      %32 = vector.shape_cast %29 : vector<16x8xf32> to vector<1x1x16x8xf32>
      tpu.vector_store %arg5[%c0_30, %c4, %c0_31, %c0_32], %32 {strides = array<i32>} : memref<1x12x16x8xf32, #tpu.memory_space<vmem>>, vector<1x1x16x8xf32>,
      %c0_33 = arith.constant 0 : index
      %c40 = arith.constant 40 : index
      %33 = vector.load %arg6[%c0_33, %c40] : memref<16x96xf32, #tpu.memory_space<vmem>>, vector<16x8xf32>
      %c0_34 = arith.constant 0 : index
      %c5 = arith.constant 5 : index
      %c0_35 = arith.constant 0 : index
      %c0_36 = arith.constant 0 : index
      %34 = vector.load %arg5[%c0_34, %c5, %c0_35, %c0_36] : memref<1x12x16x8xf32, #tpu.memory_space<vmem>>, vector<1x1x16x8xf32>
      %35 = vector.shape_cast %34 : vector<1x1x16x8xf32> to vector<16x8xf32>
      %36 = vector.shape_cast %33 : vector<16x8xf32> to vector<1x1x16x8xf32>
      tpu.vector_store %arg5[%c0_34, %c5, %c0_35, %c0_36], %36 {strides = array<i32>} : memref<1x12x16x8xf32, #tpu.memory_space<vmem>>, vector<1x1x16x8xf32>,
      %c0_37 = arith.constant 0 : index
      %c48 = arith.constant 48 : index
      %37 = vector.load %arg6[%c0_37, %c48] : memref<16x96xf32, #tpu.memory_space<vmem>>, vector<16x8xf32>
      %c0_38 = arith.constant 0 : index
      %c6 = arith.constant 6 : index
      %c0_39 = arith.constant 0 : index
      %c0_40 = arith.constant 0 : index
      %38 = vector.load %arg5[%c0_38, %c6, %c0_39, %c0_40] : memref<1x12x16x8xf32, #tpu.memory_space<vmem>>, vector<1x1x16x8xf32>
      %39 = vector.shape_cast %38 : vector<1x1x16x8xf32> to vector<16x8xf32>
      %40 = vector.shape_cast %37 : vector<16x8xf32> to vector<1x1x16x8xf32>
      tpu.vector_store %arg5[%c0_38, %c6, %c0_39, %c0_40], %40 {strides = array<i32>} : memref<1x12x16x8xf32, #tpu.memory_space<vmem>>, vector<1x1x16x8xf32>,
      %c0_41 = arith.constant 0 : index
      %c56 = arith.constant 56 : index
      %41 = vector.load %arg6[%c0_41, %c56] : memref<16x96xf32, #tpu.memory_space<vmem>>, vector<16x8xf32>
      %c0_42 = arith.constant 0 : index
      %c7 = arith.constant 7 : index
      %c0_43 = arith.constant 0 : index
      %c0_44 = arith.constant 0 : index
      %42 = vector.load %arg5[%c0_42, %c7, %c0_43, %c0_44] : memref<1x12x16x8xf32, #tpu.memory_space<vmem>>, vector<1x1x16x8xf32>
      %43 = vector.shape_cast %42 : vector<1x1x16x8xf32> to vector<16x8xf32>
      %44 = vector.shape_cast %41 : vector<16x8xf32> to vector<1x1x16x8xf32>
      tpu.vector_store %arg5[%c0_42, %c7, %c0_43, %c0_44], %44 {strides = array<i32>} : memref<1x12x16x8xf32, #tpu.memory_space<vmem>>, vector<1x1x16x8xf32>,
      %c0_45 = arith.constant 0 : index
      %c64 = arith.constant 64 : index
      %45 = vector.load %arg6[%c0_45, %c64] : memref<16x96xf32, #tpu.memory_space<vmem>>, vector<16x8xf32>
      %c0_46 = arith.constant 0 : index
      %c8_47 = arith.constant 8 : index
      %c0_48 = arith.constant 0 : index
      %c0_49 = arith.constant 0 : index
      %46 = vector.load %arg5[%c0_46, %c8_47, %c0_48, %c0_49] : memref<1x12x16x8xf32, #tpu.memory_space<vmem>>, vector<1x1x16x8xf32>
      %47 = vector.shape_cast %46 : vector<1x1x16x8xf32> to vector<16x8xf32>
      %48 = vector.shape_cast %45 : vector<16x8xf32> to vector<1x1x16x8xf32>
      tpu.vector_store %arg5[%c0_46, %c8_47, %c0_48, %c0_49], %48 {strides = array<i32>} : memref<1x12x16x8xf32, #tpu.memory_space<vmem>>, vector<1x1x16x8xf32>,
      %c0_50 = arith.constant 0 : index
      %c72 = arith.constant 72 : index
      %49 = vector.load %arg6[%c0_50, %c72] : memref<16x96xf32, #tpu.memory_space<vmem>>, vector<16x8xf32>
      %c0_51 = arith.constant 0 : index
      %c9 = arith.constant 9 : index
      %c0_52 = arith.constant 0 : index
      %c0_53 = arith.constant 0 : index
      %50 = vector.load %arg5[%c0_51, %c9, %c0_52, %c0_53] : memref<1x12x16x8xf32, #tpu.memory_space<vmem>>, vector<1x1x16x8xf32>
      %51 = vector.shape_cast %50 : vector<1x1x16x8xf32> to vector<16x8xf32>
      %52 = vector.shape_cast %49 : vector<16x8xf32> to vector<1x1x16x8xf32>
      tpu.vector_store %arg5[%c0_51, %c9, %c0_52, %c0_53], %52 {strides = array<i32>} : memref<1x12x16x8xf32, #tpu.memory_space<vmem>>, vector<1x1x16x8xf32>,
      %c0_54 = arith.constant 0 : index
      %c80 = arith.constant 80 : index
      %53 = vector.load %arg6[%c0_54, %c80] : memref<16x96xf32, #tpu.memory_space<vmem>>, vector<16x8xf32>
      %c0_55 = arith.constant 0 : index
      %c10 = arith.constant 10 : index
      %c0_56 = arith.constant 0 : index
      %c0_57 = arith.constant 0 : index
      %54 = vector.load %arg5[%c0_55, %c10, %c0_56, %c0_57] : memref<1x12x16x8xf32, #tpu.memory_space<vmem>>, vector<1x1x16x8xf32>
      %55 = vector.shape_cast %54 : vector<1x1x16x8xf32> to vector<16x8xf32>
      %56 = vector.shape_cast %53 : vector<16x8xf32> to vector<1x1x16x8xf32>
      tpu.vector_store %arg5[%c0_55, %c10, %c0_56, %c0_57], %56 {strides = array<i32>} : memref<1x12x16x8xf32, #tpu.memory_space<vmem>>, vector<1x1x16x8xf32>,
      %c0_58 = arith.constant 0 : index
      %c88 = arith.constant 88 : index
      %57 = vector.load %arg6[%c0_58, %c88] : memref<16x96xf32, #tpu.memory_space<vmem>>, vector<16x8xf32>
      %c0_59 = arith.constant 0 : index
      %c11 = arith.constant 11 : index
      %c0_60 = arith.constant 0 : index
      %c0_61 = arith.constant 0 : index
      %58 = vector.load %arg5[%c0_59, %c11, %c0_60, %c0_61] : memref<1x12x16x8xf32, #tpu.memory_space<vmem>>, vector<1x1x16x8xf32>
      %59 = vector.shape_cast %58 : vector<1x1x16x8xf32> to vector<16x8xf32>
      %60 = vector.shape_cast %57 : vector<16x8xf32> to vector<1x1x16x8xf32>
      tpu.vector_store %arg5[%c0_59, %c11, %c0_60, %c0_61], %60 {strides = array<i32>} : memref<1x12x16x8xf32, #tpu.memory_space<vmem>>, vector<1x1x16x8xf32>,
    } else {
    }
    return
  }
  func.func @transform_0(%arg0: i32, %arg1: i32, %arg2: i32) -> (i32, i32, i32) {
    %c0_i32 = arith.constant 0 : i32
    return %arg0, %arg1, %arg2 : i32, i32, i32
  }
  func.func @transform_1(%arg0: i32, %arg1: i32, %arg2: i32) -> (i32, i32) {
    %c0_i32 = arith.constant 0 : i32
    %c0_i32_0 = arith.constant 0 : i32
    return %arg2, %c0_i32 : i32, i32
  }
  func.func @transform_2(%arg0: i32, %arg1: i32, %arg2: i32) -> (i32, i32, i32, i32) {
    %c0_i32 = arith.constant 0 : i32
    %c0_i32_0 = arith.constant 0 : i32
    %c0_i32_1 = arith.constant 0 : i32
    return %arg0, %c0_i32, %arg1, %c0_i32_0 : i32, i32, i32, i32
  }
}

</mosaic_0001>

<bundles_post_ra>
// kernel: tpu_custom_call.1
= control target key start
LH: loop header
LB: loop body
LE: loop exit
PB: predicated region body
PF: predicated region fallthrough
CT: control target
= control target key end

     0   :  { %7 = vsyncpa [#allocation4], 0  ;;  %s1635_s0 = inlined_call_operand.hbm [shape: f32[2,16,32], index: 0, kind: input, shape index: {}]   ;;  %s1636_s1 = inlined_call_operand.hbm [shape: f32[32,96], index: 1, kind: input, shape index: {}]   ;;  %s1637_s2 = inlined_call_operand.vmem [shape: f32[2,12,16,8], index: 2, kind: output, shape index: {}]  }
   0x1   :  { %9 = vsyncpa [#allocation4 + $0x1], 0 }
   0x2   :  { %10 = vsyncpa [#allocation6], 0  ;;  %s1404_s9 = smov 0   ;;  %s1406_s10 = smov 0  }
   0x3   :  { %s1408_s11 = smov 0   ;;  %s1410_s12 = smov 0  }
   0x4   :  { %s1412_s13 = smov 0   ;;  %s1414_s14 = smov 0  }
   0x5 LB: > { %s1043_s15 = sadd.s32 4294967295, %s1371_s14   ;;  %p59_p0 = scmp.ne.s32.totalorder %s1355_s10, %s1351_s9  ;;  %s1371_s14 = sphi %s1414_s14, %s16_s14   ;;  %s1367_s13 = sphi %s1412_s13, %s1647_s13   ;;  %s1363_s12 = sphi %s1410_s12, %s1646_s12   ;;  %s1359_s11 = sphi %s1408_s11, %s1645_s11   ;;  %s1355_s10 = sphi %s1406_s10, %s1644_s10   ;;  %s1351_s9 = sphi %s1404_s9, %s1643_s9  }
   0x6   : > { %p1434_p1 = scmp.eq.s32.totalorder %s1043_s15, 0  ;;  %p1045_p2 = scmp.ge.s32.totalorder %s1371_s14, 1 }
   0x7   : > { %p124_p3 = scmp.lt.s32.totalorder %s1371_s14, 3  ;;  %s1373_s19 = smov [#allocation5]  }
   0x8   : > { %p1442_p4 = por %p1434_p1, %p59_p0  ;;  %s139_s20 = sshll.u32 %s1373_s19, 4  ;;  %s140_s20 = int_to_ptr.vmem [resolvable:$true] %s139_s20 }
   0x9   : > { %p1446_p5 = pnand %p1045_p2, %p124_p3  ;;  %s35_s22 = sadd.s32 1, %s1367_s13 }
   0xa   : > { %s1274_s23 = scalar_lea.vmem %s140_s20, 512  ;;  %p1282_p12 = scmp.lt.s32.totalorder %s140_s20, %s140_s20 }
   0xb   : > { %p1189_p6 = pneg %p1446_p5  ;;  %p1275_p9 = scmp.ne.s32.totalorder %s140_s20, %s1274_s23 }
   0xc   : > { %p1283_p13 = scmp.lt.s32.totalorder %s1274_s23, %s1274_s23 }
   0xd   : > { %p1454_p7 = pnand %p1189_p6, %p1434_p1 }
   0xe   : > { %p1284_p0 = por %p1283_p13, %p1282_p12 }
   0xf   : > { %p1265_p8 = pneg %p1454_p7 }
  0x11   : > { %p1277_p10 = pnand %p1275_p9, %p1265_p8 }
  0x13   : > { %p1278_p11 = pneg %p1277_p10 }
  0x15   : > { %p1285_p2 = pnand %p1284_p0, %p1278_p11 }
  0x17   : > { %1288 = shalt.err (!%p1285_p2)
}
  0x18   : > { %s1374_s24 = smov 128   ;;  %s1375_s25 = smov 8  }
  0x19   : > { %1192 = dma.hbm_to_vmem [thread:$0]  (!%p1454_p7), %s1636_s1, 512, %s140_s20, [#allocation6], %s1374_s24, %s1374_s24, %s1375_s25  }
  0x1a   : > { %p37_p3 = scmp.ge.s32.totalorder %s35_s22, 2  ;;  %s46_s28 = sadd.s32 1, %s1359_s11 }
  0x1b   : > { %p53_p6 = scmp.ne.s32.totalorder %s1359_s11, %s1355_s10  ;;  %p54_p8 = scmp.eq.s32.totalorder %s1371_s14, 0 }
  0x1c   : > { %s1649_s22 = smov (%p37_p3, %s35_s22), 0  ;;  %p1198_p10 = scmp.lt.s32.totalorder %s1371_s14, 2 }
  0x1d   : > { %p55_p9 = por %p54_p8, %p53_p6  ;;  %s39_s29 = ssub.s32 %s1367_s13, %s1649_s22 }
  0x1e   : > { %s153_s30 = sand.u32 1, %s1359_s11   ;;  %p44_p11 = scmp.eq.s32.totalorder %s39_s29, 0 }
  0x1f   : > { %s1048_s3 = sshll.u32 %s153_s30, 4  ;;  %s1079_s4 = sshll.u32 %s1367_s13, 8 }
  0x20   : > { %s1481_s5 = scalar_select %p44_p11, %s1359_s11, %s46_s28  }
  0x21   : > { %s166_s8 = scalar_lea.hbm %s1635_s0, %s1079_s4  ;;  %s157_s9 = scalar_lea.vmem [#allocation3], %s1048_s3 }
  0x22   : > { %s167_s15 = sshll.u32 %s157_s9, 4  ;;  %p1486_p7 = pnand %p1198_p10, %p55_p9  ;;  %s168_s15 = int_to_ptr.vmem [resolvable:$true] %s167_s15 }
  0x23   : > { %s154_s20 = scalar_lea.sflag [#allocation4], %s153_s30  ;;  %s1302_s21 = scalar_lea.vmem %s168_s15, 256 }
  0x24   : > { %p1291_p12 = pneg %p1486_p7  ;;  %p1303_p13 = scmp.ne.s32.totalorder %s168_s15, %s1302_s21 }
  0x25   : > { %s1376_s23 = smov [#allocation3]  }
  0x26   : > { %p1305_p0 = pnand %p1303_p13, %p1291_p12  ;;  %s1307_s26 = sshll.u32 %s1376_s23, 4  ;;  %s1308_s26 = int_to_ptr.vmem [resolvable:$false] %s1307_s26 }
  0x27   : > { %s1309_s27 = scalar_lea.vmem %s1308_s26, 512  ;;  %p1310_p3 = scmp.lt.s32.totalorder %s168_s15, %s1308_s26 }
  0x28   : > { %p1306_p2 = pneg %p1305_p0  ;;  %p1311_p6 = scmp.lt.s32.totalorder %s1309_s27, %s1302_s21 }
  0x2a   : > { %p1312_p8 = por %p1311_p6, %p1310_p3 }
  0x2c   : > { %p1313_p9 = pnand %p1312_p8, %p1306_p2 }
  0x2e   : > { %1316 = shalt.err (!%p1313_p9)
}
  0x2f   : > { %1196 = dma.hbm_to_vmem [thread:$0]  (!%p1486_p7), %s166_s8, 256, %s168_s15, %s154_s20, %s1374_s24, %s1374_s24, %s1375_s25  }
  0x30   : > { %179 = sbr.rel (%p1446_p5) target bundleno = 456 (0x1c8), region = 28  ;;  %s181_s28 = sand.u32 (!%p1446_p5), 1, %s1355_s10  }
  0x31   : > { %s1052_s29 = sshll.u32 (!%p1446_p5), %s181_s28, 4  ;;  %s182_s30 = scalar_lea.sflag (!%p1446_p5), [#allocation4], %s181_s28 }
  0x32   : > { %s185_s3 = scalar_lea.vmem (!%p1446_p5), [#allocation3], %s1052_s29 }
  0x35   : > { %1342 = dma.done.wait (%p1442_p4), %s182_s30, 256  }
  0x36   : > { %1344 = vsyncadd (%p1442_p4), %s182_s30, 4294967040 }
  0x37   : > { %1346 = dma.done.wait (%p1434_p1), [#allocation6], 512  }
  0x38   : > { %1348 = vsyncadd (%p1434_p1), [#allocation6], 4294966784  ;;  %vm241_vm0 = vcmask 261120   ;;  %v240_v0 = vld [vmem:[#allocation5 + $0x18] sm:$0xff]  ;;  %v239_v1 = vld [vmem:[#allocation5 + $0x10] sm:$0xff]  ;;  %vm230_vm1 = vcmask 785408  }
  0x39   : > { %v238_v2 = vld [vmem:[#allocation5 + $0x8] sm:$0xff]  ;;  %v1508_v3 = vand.u32 4294901760, %v240_v0  ;;  %v1510_v4 = vand.u32 4294901760, %v239_v1  ;;  %v237_v6 = vld [vmem:[#allocation5] sm:$0xff]  ;;  %v1377_v38 = vmov 0.0   ;;  %p217_p1 = scmp.lt.s32.totalorder %s1363_s12, 1 }
  0x3a   : > { %v1512_v5 = vand.u32 4294901760, %v238_v2  ;;  %v235_v7 = vld [vmem:[%s185_s3] sm:$0xff]  ;;  %v236_v8 = vld [vmem:[%s185_s3 + $0x8] sm:$0xff]  ;;  %v1514_v9 = vand.u32 4294901760, %v237_v6  ;;  %232 = vst.msk [vmem:[#allocation2 + $0x8] sm:$0xff] %vm230_vm1, %v1377_v38  ;;  %231 = vst.msk [vmem:[#allocation2] sm:$0xff] %vm230_vm1, %v1377_v38 }
  0x3b   : > { %v243_v10 = vsel %vm241_vm0, %v235_v7, 0  ;;  %v246_v11 = vsel %vm241_vm0, %v236_v8, 0  ;;  %1116 = vmatprep.subr.mxu0 %v1508_v3  ;;  %v363_v12 = vsub.f32 %v240_v0, %v1508_v3  ;;  %v370_v15 = vsub.f32 %v239_v1, %v1510_v4  ;;  %s1651_s12 = smov (!%p217_p1, %s1363_s12), 1  ;;  %s1378_s25 = smov 112  }
  0x3c   : > { %v1518_v13 = vand.u32 4294901760, %v243_v10  ;;  %v1520_v14 = vand.u32 4294901760, %v246_v11  ;;  %1117 = vmatpush3.msra.mxu0 %v1508_v3  ;;  %v377_v16 = vsub.f32 %v238_v2, %v1512_v5  ;;  %v384_v17 = vsub.f32 %v237_v6, %v1514_v9  ;;  %s1182_s16 = smul.u32 192, %s1651_s12  ;;  %s1379_s12 = smov 120  }
  0x3d   : > { %1118 = vmatprep.subr.mxu0 %v1510_v4  ;;  %v364_v18 = vand.u32 4294901760, %v363_v12  ;;  %v371_v20 = vand.u32 4294901760, %v370_v15  ;;  %vm786_vm2 = vcmask 64512   ;;  %s1380_s4 = smov 104   ;;  %s1381_s6 = smov 96  }
  0x3e   : > { %v318_v19 = vsub.f32 %v243_v10, %v1518_v13  ;;  %v328_v21 = vsub.f32 %v246_v11, %v1520_v14  ;;  %1135 = vmatprep.mubr.f32.mxu1 %v1518_v13  ;;  %1119 = vmatpush3.msra.mxu0 %v1510_v4  ;;  %v378_v22 = vand.u32 4294901760, %v377_v16  ;;  %v385_v23 = vand.u32 4294901760, %v384_v17  ;;  %s1565_s24 = scalar_lea.vmem %s1637_s2, %s1182_s16  ;;  %s1382_s7 = smov 88  }
  0x3f   : > { %1120 = vmatprep.subr.mxu0 %v1512_v5  ;;  %v365_v24 = vsub.f32 %v363_v12, %v364_v18  ;;  %v372_v26 = vsub.f32 %v370_v15, %v371_v20  ;;  %s1383_s8 = smov 80   ;;  %s1384_s9 = smov 72  }
  0x40   : > { %v319_v25 = vand.u32 4294901760, %v318_v19  ;;  %v329_v27 = vand.u32 4294901760, %v328_v21  ;;  %1121 = vmatpush3.msra.mxu0 %v1512_v5  ;;  %v379_v28 = vsub.f32 %v377_v16, %v378_v22  ;;  %v386_v29 = vsub.f32 %v384_v17, %v385_v23  ;;  %s1385_s15 = smov 64   ;;  %s1386_s19 = smov 56  }
  0x41   : > { %1122 = vmatprep.subr.mxu0 %v1514_v9  ;;  %v366_v30 = vand.u32 4294901760, %v365_v24  ;;  %v373_v32 = vand.u32 4294901760, %v372_v26  ;;  %v234_v56 = vld [vmem:[#allocation2 + $0x8] sm:$0xff]  ;;  %v233_v60 = vld [vmem:[#allocation2] sm:$0xff]  ;;  %s1387_s20 = smov 48   ;;  %s1388_s21 = smov 40  }
  0x42   : > { %v320_v31 = vsub.f32 %v318_v19, %v319_v25  ;;  %v330_v33 = vsub.f32 %v328_v21, %v329_v27  ;;  %1123 = vmatpush3.msra.mxu0 %v1514_v9  ;;  %v380_v36 = vand.u32 4294901760, %v379_v28  ;;  %v387_v37 = vand.u32 4294901760, %v386_v29 }
  0x43   : > { %1127 = vmatprep.subr.mxu1 %v366_v30  ;;  %1138 = vmatprep.subr.mxu0 %v363_v12 }
  0x44   : > { %v321_v34 = vand.u32 4294901760, %v320_v31  ;;  %v331_v35 = vand.u32 4294901760, %v330_v33  ;;  %1128 = vmatpush3.msra.mxu1 %v366_v30 }
  0x45   : > { %1129 = vmatprep.subr.mxu1 %v373_v32 }
  0x46   : > { %1124 = vmatprep.mubr.f32.mxu0 %v321_v34  ;;  %1130 = vmatpush3.msra.mxu1 %v373_v32 }
  0x47   : > { %1125 = vmatmul.mubr.f32.vlgmr.msra.gmra.mxu0 %v331_v35  ;;  %1131 = vmatprep.subr.mxu1 %v380_v36 }
  0x48   : > { %1139 = vmatpush3.msra.mxu0 %v363_v12  ;;  %1132 = vmatpush3.msra.mxu1 %v380_v36 }
  0x49   : > { %1140 = vmatprep.subr.mxu0 %v370_v15  ;;  %1133 = vmatprep.subr.mxu1 %v387_v37 }
  0x4a   : > { %1141 = vmatpush3.msra.mxu0 %v370_v15  ;;  %1134 = vmatpush3.msra.mxu1 %v387_v37 }
  0x4b   : > { %1142 = vmatprep.subr.mxu0 %v377_v16  ;;  %1136 = vmatmul.mubr.f32.vlgmr.msra.gmra.mxu1 %v1520_v14 }
  0x4c   : > { %1143 = vmatpush3.msra.mxu0 %v377_v16  ;;  %1149 = vmatprep.subr.mxu1 %v1508_v3 }
  0x4d   : > { %1144 = vmatprep.subr.mxu0 %v384_v17  ;;  %1146 = vmatprep.mubr.f32.mxu0 %v318_v19 }
  0x4e   : > { %1145 = vmatpush3.msra.mxu0 %v384_v17  ;;  %1150 = vmatpush3.msra.mxu1 %v1508_v3 }
  0x4f   : > { %1147 = vmatmul.mubr.f32.vlgmr.msra.gmra.mxu0 %v328_v21  ;;  %1151 = vmatprep.subr.mxu1 %v1510_v4 }
  0x50   : > { %1160 = vmatprep.subr.mxu0 %v364_v18  ;;  %1152 = vmatpush3.msra.mxu1 %v1510_v4 }
  0x51   : > { %1161 = vmatpush3.msra.mxu0 %v364_v18  ;;  %1153 = vmatprep.subr.mxu1 %v1512_v5 }
  0x52   : > { %1162 = vmatprep.subr.mxu0 %v371_v20  ;;  %1154 = vmatpush3.msra.mxu1 %v1512_v5 }
  0x53   : > { %1163 = vmatpush3.msra.mxu0 %v371_v20  ;;  %1155 = vmatprep.subr.mxu1 %v1514_v9 }
  0x54   : > { %1164 = vmatprep.subr.mxu0 %v378_v22  ;;  %1156 = vmatpush3.msra.mxu1 %v1514_v9 }
  0x55   : > { %1157 = vmatprep.mubr.f32.mxu1 %v319_v25  ;;  %1165 = vmatpush3.msra.mxu0 %v378_v22 }
  0x56   : > { %1158 = vmatmul.mubr.f32.vlgmr.msra.gmra.mxu1 %v329_v27  ;;  %1166 = vmatprep.subr.mxu0 %v385_v23 }
  0x57   : > { %1171 = vmatprep.subr.mxu1 %v1508_v3  ;;  %1167 = vmatpush3.msra.mxu0 %v385_v23 }
  0x58   : > { %1168 = vmatprep.mubr.f32.mxu0 %v1518_v13  ;;  %1172 = vmatpush3.msra.mxu1 %v1508_v3 }
  0x59   : > { %1169 = vmatmul.mubr.f32.vlgmr.msra.gmra.mxu0 %v1520_v14  ;;  %1173 = vmatprep.subr.mxu1 %v1510_v4 }
  0x5a   : > { %1179 = vmatprep.mubr.f32.mxu1 %v1518_v13  ;;  %1174 = vmatpush3.msra.mxu1 %v1510_v4 }
  0x5b   : > { %1175 = vmatprep.subr.mxu1 %v1512_v5 }
  0x5c   : > { %1176 = vmatpush3.msra.mxu1 %v1512_v5 }
  0x5d   : > { %1177 = vmatprep.subr.mxu1 %v1514_v9 }
  0x5e   : > { %1178 = vmatpush3.msra.mxu1 %v1514_v9 }
  0x5f   : > { %1180 = vmatmul.mubr.f32.vlgmr.msra.gmra.mxu1 %v1520_v14 }
 0x107   : > { %v1126_v39 = vpop.f32.mrf.mxu0 }
 0x109   : > { %v323_v40 = vpop.f32.mrf.mxu0 }
 0x10b   : > { %v1137_v41 = vpop.f32.mrf.mxu1 }
 0x10c   : > { %v431_v44 = vadd.f32 %v1137_v41, %v1126_v39 }
 0x10d   : > { %v424_v42 = vpop.f32.mrf.mxu1 }
 0x10e   : > { %v425_v46 = vadd.f32 %v424_v42, %v323_v40 }
 0x10f   : > { %v1148_v43 = vpop.f32.mrf.mxu0 }
 0x110   : > { %v518_v48 = vadd.f32 %v1148_v43, %v431_v44 }
 0x111   : > { %v510_v47 = vpop.f32.mrf.mxu0 }
 0x112   : > { %v511_v51 = vadd.f32 %v510_v47, %v425_v46 }
 0x116   : > { %v1159_v45 = vpop.f32.mrf.mxu1 }
 0x117   : > { %v603_v52 = vadd.f32 %v1159_v45, %v518_v48 }
 0x118   : > { %v594_v49 = vpop.f32.mrf.mxu1 }
 0x119   : > { %v1170_v50 = vpop.f32.mrf.mxu0  ;;  %v595_v53 = vadd.f32 %v594_v49, %v511_v51 }
 0x11a   : > { %v692_v55 = vadd.f32 %v1170_v50, %v603_v52 }
 0x11b   : > { %v685_v54 = vpop.f32.mrf.mxu0 }
 0x11c   : > { %v686_v58 = vadd.f32 %v685_v54, %v595_v53 }
 0x11f   : > { %v1181_v57 = vpop.f32.mrf.mxu1 }
 0x120   : > { %v773_v59 = vadd.f32 %v1181_v57, %v692_v55 }
 0x121   : > { %v766_v61 = vpop.f32.mrf.mxu1 }
 0x122   : > { %v777_v62 = vadd.f32 %v773_v59, %v234_v56  ;;  %v767_v63 = vadd.f32 %v766_v61, %v686_v58 }
 0x124   : > { %780 = vst.msk [vmem:[#allocation2 + $0x8] sm:$0xff] %vm230_vm1, %v777_v62  ;;  %v776_v0 = vadd.f32 %v767_v63, %v233_v60 }
 0x126   : > { %779 = vst.msk [vmem:[#allocation2] sm:$0xff] %vm230_vm1, %v776_v0 }
 0x12b   : > { %v785_v1 = vld [vmem:[#allocation2 + $0x8] sm:$0xff] }
 0x12c   : > { %788 = vst.msk [vmem:[%s1565_s24 + $0x8] sm:$0xff] %vm786_vm2, %v785_v1  ;;  %808 = vrot.lane.b32.xlu1 %v785_v1, %s1378_s25  ;;  %795 = vrot.lane.b32.xlu0 %v785_v1, %s1379_s12 }
 0x12d   : > { %v784_v2 = vld [vmem:[#allocation2] sm:$0xff] }
 0x12e   : > { %787 = vst.msk [vmem:[%s1565_s24] sm:$0xff] %vm786_vm2, %v784_v2 }
 0x130   : > { %821 = vrot.lane.b32.xlu1 %v785_v1, %s1380_s4  ;;  %793 = vrot.lane.b32.xlu0 %v784_v2, %s1379_s12 }
 0x134   : > { %834 = vrot.lane.b32.xlu1 %v785_v1, %s1381_s6  ;;  %819 = vrot.lane.b32.xlu0 %v784_v2, %s1380_s4 }
 0x138   : > { %847 = vrot.lane.b32.xlu1 %v785_v1, %s1382_s7  ;;  %832 = vrot.lane.b32.xlu0 %v784_v2, %s1381_s6 }
 0x13c   : > { %860 = vrot.lane.b32.xlu1 %v785_v1, %s1383_s8  ;;  %845 = vrot.lane.b32.xlu0 %v784_v2, %s1382_s7 }
 0x140   : > { %873 = vrot.lane.b32.xlu1 %v785_v1, %s1384_s9  ;;  %858 = vrot.lane.b32.xlu0 %v784_v2, %s1383_s8 }
 0x144   : > { %886 = vrot.lane.b32.xlu1 %v785_v1, %s1385_s15  ;;  %871 = vrot.lane.b32.xlu0 %v784_v2, %s1384_s9 }
 0x148   : > { %899 = vrot.lane.b32.xlu1 %v785_v1, %s1386_s19  ;;  %884 = vrot.lane.b32.xlu0 %v784_v2, %s1385_s15 }
 0x14c   : > { %912 = vrot.lane.b32.xlu1 %v785_v1, %s1387_s20  ;;  %897 = vrot.lane.b32.xlu0 %v784_v2, %s1386_s19 }
 0x150   : > { %806 = vrot.lane.b32.xlu1 %v784_v2, %s1378_s25  ;;  %910 = vrot.lane.b32.xlu0 %v784_v2, %s1387_s20 }
 0x154   : > { %925 = vrot.lane.b32.xlu1 %v785_v1, %s1388_s21  ;;  %923 = vrot.lane.b32.xlu0 %v784_v2, %s1388_s21 }
 0x19e   : > { %v809_v3 = vpop.permute.xlu1 %808  ;;  %v796_v4 = vpop.permute.xlu0 %795 }
 0x19f   : > { %1058 = vst.msk [vmem:[%s1565_s24 + $0x28] sm:$0xff] %vm786_vm2, %v809_v3  ;;  %1056 = vst.msk [vmem:[%s1565_s24 + $0x18] sm:$0xff] %vm786_vm2, %v796_v4 }
 0x1a2   : > { %v822_v5 = vpop.permute.xlu1 %821  ;;  %v794_v6 = vpop.permute.xlu0 %793 }
 0x1a3   : > { %1060 = vst.msk [vmem:[%s1565_s24 + $0x38] sm:$0xff] %vm786_vm2, %v822_v5  ;;  %1055 = vst.msk [vmem:[%s1565_s24 + $0x10] sm:$0xff] %vm786_vm2, %v794_v6 }
 0x1a6   : > { %v835_v7 = vpop.permute.xlu1 %834  ;;  %v820_v8 = vpop.permute.xlu0 %819 }
 0x1a7   : > { %1062 = vst.msk [vmem:[%s1565_s24 + $0x48] sm:$0xff] %vm786_vm2, %v835_v7  ;;  %1059 = vst.msk [vmem:[%s1565_s24 + $0x30] sm:$0xff] %vm786_vm2, %v820_v8 }
 0x1aa   : > { %v848_v9 = vpop.permute.xlu1 %847  ;;  %v833_v10 = vpop.permute.xlu0 %832 }
 0x1ab   : > { %1064 = vst.msk [vmem:[%s1565_s24 + $0x58] sm:$0xff] %vm786_vm2, %v848_v9  ;;  %1061 = vst.msk [vmem:[%s1565_s24 + $0x40] sm:$0xff] %vm786_vm2, %v833_v10 }
 0x1ae   : > { %v861_v11 = vpop.permute.xlu1 %860  ;;  %v846_v12 = vpop.permute.xlu0 %845 }
 0x1af   : > { %1066 = vst.msk [vmem:[%s1565_s24 + $0x68] sm:$0xff] %vm786_vm2, %v861_v11  ;;  %1063 = vst.msk [vmem:[%s1565_s24 + $0x50] sm:$0xff] %vm786_vm2, %v846_v12 }
 0x1b2   : > { %v874_v13 = vpop.permute.xlu1 %873  ;;  %v859_v14 = vpop.permute.xlu0 %858 }
 0x1b3   : > { %1068 = vst.msk [vmem:[%s1565_s24 + $0x78] sm:$0xff] %vm786_vm2, %v874_v13  ;;  %1065 = vst.msk [vmem:[%s1565_s24 + $0x60] sm:$0xff] %vm786_vm2, %v859_v14 }
 0x1b6   : > { %v887_v15 = vpop.permute.xlu1 %886  ;;  %v872_v16 = vpop.permute.xlu0 %871 }
 0x1b7   : > { %1070 = vst.msk [vmem:[%s1565_s24 + $0x88] sm:$0xff] %vm786_vm2, %v887_v15  ;;  %1067 = vst.msk [vmem:[%s1565_s24 + $0x70] sm:$0xff] %vm786_vm2, %v872_v16 }
 0x1ba   : > { %v900_v17 = vpop.permute.xlu1 %899  ;;  %v885_v18 = vpop.permute.xlu0 %884 }
 0x1bb   : > { %1072 = vst.msk [vmem:[%s1565_s24 + $0x98] sm:$0xff] %vm786_vm2, %v900_v17  ;;  %1069 = vst.msk [vmem:[%s1565_s24 + $0x80] sm:$0xff] %vm786_vm2, %v885_v18 }
 0x1be   : > { %v913_v19 = vpop.permute.xlu1 %912  ;;  %v898_v20 = vpop.permute.xlu0 %897 }
 0x1bf   : > { %1074 = vst.msk [vmem:[%s1565_s24 + $0xa8] sm:$0xff] %vm786_vm2, %v913_v19  ;;  %1071 = vst.msk [vmem:[%s1565_s24 + $0x90] sm:$0xff] %vm786_vm2, %v898_v20 }
 0x1c2   : > { %v807_v21 = vpop.permute.xlu1 %806  ;;  %v911_v22 = vpop.permute.xlu0 %910 }
 0x1c3   : > { %1057 = vst.msk [vmem:[%s1565_s24 + $0x20] sm:$0xff] %vm786_vm2, %v807_v21  ;;  %1073 = vst.msk [vmem:[%s1565_s24 + $0xa0] sm:$0xff] %vm786_vm2, %v911_v22 }
 0x1c6   : > { %v926_v23 = vpop.permute.xlu1 %925  ;;  %v924_v24 = vpop.permute.xlu0 %923 }
 0x1c7   : > { %1076 = vst.msk [vmem:[%s1565_s24 + $0xb8] sm:$0xff] %vm786_vm2, %v926_v23  ;;  %1075 = vst.msk [vmem:[%s1565_s24 + $0xb0] sm:$0xff] %vm786_vm2, %v924_v24 }
 0x1c8 PF: > { %s16_s14 = sadd.s32 1, %s1371_s14   ;;  %s1643_s9 = smov %s1355_s10 }
 0x1c9   : > { %p13_p4 = scmp.ge.s32.totalorder %s16_s14, 4   ;;  %s1644_s10 = smov %s1359_s11 }
 0x1ca   : > { %s1645_s11 = smov %s1481_s5  ;;  %s1646_s12 = smov %s1367_s13 }
 0x1cb   : > { %s1647_s13 = smov %s1649_s22  ;;  %15 = sbr.rel (!%p13_p4) target bundleno = 5 (0x5), region = 92 }
 0x1d0   :  { %962 = vsyncpa [#allocation4], 1 }
 0x1d1   :  { %964 = vsyncpa [#allocation4 + $0x1], 1 }
 0x1d2   :  { %965 = vsyncpa [#allocation6], 1 }

</bundles_post_ra>
